<compile_context>
chip_gen: v7x
topology: tpu7x:2x2x1
jax: 0.10.0
libtpu: 0.0.40
codegen_flags: <defaults>
</compile_context>

<pallas_src>
import functools

import jax
import jax.numpy as jnp
from jax.experimental import pallas as pl
from jax.experimental.pallas import tpu as pltpu


def _round_up(x, m):
    return ((x + m - 1) // m) * m


def _mlp_actor_kernel(obs_ref, w_ref, b_ref, noise_ref, out_ref, *,
                      n_layers, act_limit, act_noise, act_dim, obs_dim_p):
    # Layer 0: obs kept at its native (8-sublane-aligned) width; only the
    # matching weight rows are read (static, sublane-aligned slice).
    x = obs_ref[...]                                           # (B, obs_dim_p)
    x = jnp.dot(x, w_ref[0, :obs_dim_p, :],
                preferred_element_type=jnp.float32) + b_ref[0]
    x = jnp.maximum(x, 0.0)

    # Remaining hidden layers: every layer before last_layer is ReLU-activated.
    for j in range(1, n_layers - 1):
        x = jnp.dot(x, w_ref[j], preferred_element_type=jnp.float32) + b_ref[j]
        x = jnp.maximum(x, 0.0)

    # last_layer (Identity).  Padded output lanes stay exactly 0 (zero weight
    # columns + zero bias), so they do not perturb the L1 normalization.
    mu = jnp.dot(x, w_ref[n_layers - 1],
                 preferred_element_type=jnp.float32) + b_ref[n_layers - 1]

    # Gs = mean(|mu|) over the real act_dim lanes; shrink only when Gs >= 1.
    gs = jnp.sum(jnp.abs(mu), axis=1, keepdims=True) * jnp.float32(1.0 / act_dim)
    mu = mu / jnp.maximum(gs, jnp.float32(1.0))

    pi = mu + jnp.float32(act_noise) * noise_ref[...]

    # One full-width (128-lane) tanh + scale + unmasked store: [tanh(mu)|tanh(pi)].
    out_ref[...] = (jnp.tanh(jnp.concatenate([mu, pi], axis=1))
                    * jnp.float32(act_limit))


def pack_params(layer_params, d_pad):
    """layer_params: list of (W (fi, fo), b (fo,)) in forward order,
    W stored transposed vs. torch (in_features, out_features).
    Returns zero-padded W_pack (L, D, D) and b_pack (L, 1, D)."""
    n_layers = len(layer_params)
    w_pack = jnp.zeros((n_layers, d_pad, d_pad), jnp.float32)
    b_pack = jnp.zeros((n_layers, 1, d_pad), jnp.float32)
    for j, (w, b) in enumerate(layer_params):
        fi, fo = w.shape
        w_pack = w_pack.at[j, :fi, :fo].set(w)
        b_pack = b_pack.at[j, 0, :fo].set(b.reshape(-1))
    return w_pack, b_pack


@functools.partial(jax.jit, static_argnames=("act_dim", "act_limit", "act_noise"))
def mlp_actor_forward(obs, w_pack, b_pack, key, *, act_dim, act_limit, act_noise):
    """obs: (B, obs_dim) f32.  w_pack: (L, D, D), b_pack: (L, 1, D),
    key: jax PRNG key (fresh per call -> fresh exploration noise)."""
    B, obs_dim = obs.shape
    n_layers, D, _ = w_pack.shape

    # Pad obs lanes only up to the next multiple of 8 (usually a no-op);
    # padded weight rows are zero so any padding is inert.
    obs_dim_p = _round_up(obs_dim, 8)
    if obs_dim_p != obs_dim:
        obs = jnp.pad(obs, ((0, 0), (0, obs_dim_p - obs_dim)))

    # Exploration noise (fused into the same jitted executable).
    noise = jax.random.normal(key, (B, D), jnp.float32)

    kernel = functools.partial(
        _mlp_actor_kernel,
        n_layers=int(n_layers), act_limit=float(act_limit),
        act_noise=float(act_noise), act_dim=int(act_dim),
        obs_dim_p=int(obs_dim_p))

    cost = pl.CostEstimate(
        flops=int(2 * B * D * D * n_layers),
        transcendentals=int(2 * B * D),
        bytes_accessed=int(4 * (B * obs_dim_p + n_layers * D * D
                                + n_layers * D + B * D + B * 2 * D)))

    vmem = pl.BlockSpec(memory_space=pltpu.MemorySpace.VMEM)
    out = pl.pallas_call(
        kernel,
        out_shape=jax.ShapeDtypeStruct((B, 2 * D), jnp.float32),
        in_specs=[vmem, vmem, vmem, vmem],   # obs, w_pack, b_pack, noise
        out_specs=vmem,
        cost_estimate=cost,
    )(obs, w_pack, b_pack, noise)

    # Padded lanes of `out` contain squashed noise garbage; only these slices
    # are valid (fused into the jit, no extra dispatch).
    mu = out[:, :act_dim]
    pi = out[:, D:D + act_dim]
    return mu, pi


def init_params(key, obs_dim, hidden_sizes, act_dim):
    """PyTorch-style uniform(-1/sqrt(fan_in), 1/sqrt(fan_in)) init.
    Weights stored as (in_features, out_features) — transposed vs torch."""
    sizes = [obs_dim] + list(hidden_sizes) + [act_dim]
    params = []
    for fi, fo in zip(sizes[:-1], sizes[1:]):
        key, kw, kb = jax.random.split(key, 3)
        bound = 1.0 / (fi ** 0.5)
        params.append((
            jax.random.uniform(kw, (fi, fo), jnp.float32, -bound, bound),
            jax.random.uniform(kb, (fo,), jnp.float32, -bound, bound)))
    return params


if __name__ == "__main__":
    B, OBS_DIM, HIDDEN, ACT_DIM = 8, 16, (32, 32), 4
    ACT_LIMIT, ACT_NOISE = 2.0, 0.1

    key = jax.random.PRNGKey(0)
    k_obs, k_params, k_noise = jax.random.split(key, 3)

    obs = jax.random.normal(k_obs, (B, OBS_DIM), jnp.float32)
    layer_params = init_params(k_params, OBS_DIM, HIDDEN, ACT_DIM)

    # Pack once (outside the hot path); D padded to a multiple of 64 so the
    # fused [mu|pi] output is exactly 128 lanes wide.
    D = _round_up(max(OBS_DIM, *HIDDEN, ACT_DIM), 64)
    w_pack, b_pack = pack_params(layer_params, D)

    mu, pi = mlp_actor_forward(obs, w_pack, b_pack, k_noise,
                               act_dim=ACT_DIM, act_limit=ACT_LIMIT,
                               act_noise=ACT_NOISE)
    jax.block_until_ready((mu, pi))

    # ---- Pure-JAX reference (same noise: jax.random is deterministic per key). ----
    noise_ref = jax.random.normal(k_noise, (B, D), jnp.float32)

    def ref_forward(obs, plist, noise):
        x = obs
        for w, b in plist[:-1]:
            x = jnp.maximum(x @ w + b, 0.0)
        w, b = plist[-1]
        m = x @ w + b
        gs = jnp.sum(jnp.abs(m), axis=1, keepdims=True) / ACT_DIM
        m = m / jnp.where(gs >= 1.0, gs, jnp.ones_like(gs))
        p = m + ACT_NOISE * noise[:, :ACT_DIM]
        return jnp.tanh(m) * ACT_LIMIT, jnp.tanh(p) * ACT_LIMIT

    mu_ref, pi_ref = ref_forward(obs, layer_params, noise_ref)

    assert mu.shape == (B, ACT_DIM) and pi.shape == (B, ACT_DIM)
    assert jnp.allclose(mu, mu_ref, atol=1e-5), "mu mismatch"
    assert jnp.allclose(pi, pi_ref, atol=1e-5), "pi mismatch"
    assert bool(jnp.all(jnp.abs(mu) <= ACT_LIMIT + 1e-6))
    assert bool(jnp.all(jnp.abs(pi) <= ACT_LIMIT + 1e-6))
    assert bool(jnp.any(jnp.abs(pi - mu) > 1e-6)), "noise was not applied"

    print("KERNEL_OK")
</pallas_src>

<mosaic_0001>
module attributes {stable_mosaic.version = 11 : i64} {
  func.func @_mlp_actor_kernel(%arg0: memref<8x16xf32, #tpu.memory_space<vmem>>, %arg1: memref<3x64x64xf32, #tpu.memory_space<vmem>>, %arg2: memref<3x1x64xf32, #tpu.memory_space<vmem>>, %arg3: memref<8x64xf32, #tpu.memory_space<vmem>>, %arg4: memref<8x128xf32, #tpu.memory_space<vmem>>) attributes {dimension_semantics = [], scalar_prefetch = 0 : i64, scratch_operands = 0 : i64, tpu.core_type = #tpu.core_type<tc>} {
    %c0 = arith.constant 0 : index
    %c0_0 = arith.constant 0 : index
    %0 = vector.load %arg0[%c0, %c0_0] : memref<8x16xf32, #tpu.memory_space<vmem>>, vector<8x16xf32>
    %c0_1 = arith.constant 0 : index
    %c0_2 = arith.constant 0 : index
    %c0_3 = arith.constant 0 : index
    %1 = vector.load %arg1[%c0_1, %c0_2, %c0_3] : memref<3x64x64xf32, #tpu.memory_space<vmem>>, vector<1x16x64xf32>
    %2 = vector.shape_cast %1 : vector<1x16x64xf32> to vector<16x64xf32>
    %cst = arith.constant dense<0.000000e+00> : vector<8x64xf32>
    %3 = tpu.matmul %0, %2, %cst {dimension_numbers = #tpu.dot_dimension_numbers<[1], [0], [0], [1], [0, 0, 1, 1], [], []>} : vector<8x16xf32>, vector<16x64xf32>, vector<8x64xf32> -> vector<8x64xf32>
    %c0_4 = arith.constant 0 : index
    %c0_5 = arith.constant 0 : index
    %c0_6 = arith.constant 0 : index
    %4 = vector.load %arg2[%c0_4, %c0_5, %c0_6] : memref<3x1x64xf32, #tpu.memory_space<vmem>>, vector<1x1x64xf32>
    %5 = vector.shape_cast %4 : vector<1x1x64xf32> to vector<1x64xf32>
    %6 = vector.broadcast %5 : vector<1x64xf32> to vector<8x64xf32>
    %7 = arith.addf %3, %6 : vector<8x64xf32>
    %cst_7 = arith.constant 0.000000e+00 : f32
    %8 = vector.broadcast %cst_7 : f32 to vector<8x64xf32>
    %9 = arith.maximumf %7, %8 : vector<8x64xf32>
    %c1 = arith.constant 1 : index
    %c0_8 = arith.constant 0 : index
    %c0_9 = arith.constant 0 : index
    %10 = vector.load %arg1[%c1, %c0_8, %c0_9] : memref<3x64x64xf32, #tpu.memory_space<vmem>>, vector<1x64x64xf32>
    %11 = vector.shape_cast %10 : vector<1x64x64xf32> to vector<64x64xf32>
    %cst_10 = arith.constant dense<0.000000e+00> : vector<8x64xf32>
    %12 = tpu.matmul %9, %11, %cst_10 {dimension_numbers = #tpu.dot_dimension_numbers<[1], [0], [0], [1], [0, 0, 1, 1], [], []>} : vector<8x64xf32>, vector<64x64xf32>, vector<8x64xf32> -> vector<8x64xf32>
    %c1_11 = arith.constant 1 : index
    %c0_12 = arith.constant 0 : index
    %c0_13 = arith.constant 0 : index
    %13 = vector.load %arg2[%c1_11, %c0_12, %c0_13] : memref<3x1x64xf32, #tpu.memory_space<vmem>>, vector<1x1x64xf32>
    %14 = vector.shape_cast %13 : vector<1x1x64xf32> to vector<1x64xf32>
    %15 = vector.broadcast %14 : vector<1x64xf32> to vector<8x64xf32>
    %16 = arith.addf %12, %15 : vector<8x64xf32>
    %cst_14 = arith.constant 0.000000e+00 : f32
    %17 = vector.broadcast %cst_14 : f32 to vector<8x64xf32>
    %18 = arith.maximumf %16, %17 : vector<8x64xf32>
    %c2 = arith.constant 2 : index
    %c0_15 = arith.constant 0 : index
    %c0_16 = arith.constant 0 : index
    %19 = vector.load %arg1[%c2, %c0_15, %c0_16] : memref<3x64x64xf32, #tpu.memory_space<vmem>>, vector<1x64x64xf32>
    %20 = vector.shape_cast %19 : vector<1x64x64xf32> to vector<64x64xf32>
    %cst_17 = arith.constant dense<0.000000e+00> : vector<8x64xf32>
    %21 = tpu.matmul %18, %20, %cst_17 {dimension_numbers = #tpu.dot_dimension_numbers<[1], [0], [0], [1], [0, 0, 1, 1], [], []>} : vector<8x64xf32>, vector<64x64xf32>, vector<8x64xf32> -> vector<8x64xf32>
    %c2_18 = arith.constant 2 : index
    %c0_19 = arith.constant 0 : index
    %c0_20 = arith.constant 0 : index
    %22 = vector.load %arg2[%c2_18, %c0_19, %c0_20] : memref<3x1x64xf32, #tpu.memory_space<vmem>>, vector<1x1x64xf32>
    %23 = vector.shape_cast %22 : vector<1x1x64xf32> to vector<1x64xf32>
    %24 = vector.broadcast %23 : vector<1x64xf32> to vector<8x64xf32>
    %25 = arith.addf %21, %24 : vector<8x64xf32>
    %26 = math.absf %25 : vector<8x64xf32>
    %cst_21 = arith.constant dense<0.000000e+00> : vector<8xf32>
    %27 = vector.multi_reduction <add>, %26, %cst_21 [1] : vector<8x64xf32> to vector<8xf32>
    %28 = vector.shape_cast %27 : vector<8xf32> to vector<8x1xf32>
    %cst_22 = arith.constant 2.500000e-01 : f32
    %29 = vector.broadcast %cst_22 : f32 to vector<8x1xf32>
    %30 = arith.mulf %28, %29 : vector<8x1xf32>
    %cst_23 = arith.constant 1.000000e+00 : f32
    %31 = vector.broadcast %cst_23 : f32 to vector<8x1xf32>
    %32 = arith.maximumf %30, %31 : vector<8x1xf32>
    %33 = vector.broadcast %32 : vector<8x1xf32> to vector<8x64xf32>
    %34 = arith.divf %25, %33 : vector<8x64xf32>
    %c0_24 = arith.constant 0 : index
    %c0_25 = arith.constant 0 : index
    %35 = vector.load %arg3[%c0_24, %c0_25] : memref<8x64xf32, #tpu.memory_space<vmem>>, vector<8x64xf32>
    %cst_26 = arith.constant 1.000000e-01 : f32
    %36 = vector.broadcast %cst_26 : f32 to vector<8x64xf32>
    %37 = arith.mulf %36, %35 : vector<8x64xf32>
    %38 = arith.addf %34, %37 : vector<8x64xf32>
    %39 = tpu.concatenate %34, %38 in 1 : vector<8x64xf32>, vector<8x64xf32> -> vector<8x128xf32>
    %40 = math.tanh %39 : vector<8x128xf32>
    %cst_27 = arith.constant 2.000000e+00 : f32
    %41 = vector.broadcast %cst_27 : f32 to vector<8x128xf32>
    %42 = arith.mulf %40, %41 : vector<8x128xf32>
    %c0_28 = arith.constant 0 : index
    %c0_29 = arith.constant 0 : index
    %43 = vector.load %arg4[%c0_28, %c0_29] : memref<8x128xf32, #tpu.memory_space<vmem>>, vector<8x128xf32>
    tpu.vector_store %arg4[%c0_28, %c0_29], %42 {strides = array<i32>} : memref<8x128xf32, #tpu.memory_space<vmem>>, vector<8x128xf32>,
    return
  }
}

</mosaic_0001>

<bundles_post_ra>
// kernel: mlp_actor_forward.1
= control target key start
LH: loop header
LB: loop body
LE: loop exit
PB: predicated region body
PF: predicated region fallthrough
CT: control target
= control target key end

     0   :  { %9 = vsyncpa [#allocation3], 0  ;;  %s458_s15 = smov [#allocation2]   ;;  %s527_s0 = inlined_call_operand.vmem [shape: f32[8,16], index: 0, kind: input, shape index: {}]   ;;  %s528_s1 = inlined_call_operand.hbm [shape: f32[3,64,64], index: 1, kind: input, shape index: {}]   ;;  %s529_s2 = inlined_call_operand.vmem [shape: f32[3,1,64], index: 2, kind: input, shape index: {}]   ;;  %s530_s3 = inlined_call_operand.vmem [shape: f32[8,64], index: 3, kind: input, shape index: {}]   ;;  %s531_s4 = inlined_call_operand.vmem [shape: f32[8,128], index: 4, kind: output, shape index: {}]  }
   0x1   :  { %s17_s16 = sshll.u32 %s458_s15, 4  ;;  %s434_s19 = scalar_lea.hbm %s528_s1, 3072  ;;  %s18_s16 = int_to_ptr.vmem [resolvable:$true] %s17_s16 }
   0x2   :  { %p435_p0 = scmp.ne.s32.totalorder %s528_s1, %s434_s19  ;;  %p438_p1 = scmp.lt.u32.totalorder %s434_s19, %s528_s1 }
   0x4   :  { %p440_p2 = pnand %p438_p1, %p435_p0 }
   0x6   :  { %443 = shalt.err (!%p440_p2)
}
   0x7   :  { %s444_s24 = scalar_lea.vmem %s18_s16, 3072  ;;  %p449_p4 = scmp.lt.s32.totalorder %s18_s16, %s18_s16 }
   0x8   :  { %p445_p3 = scmp.ne.s32.totalorder %s18_s16, %s444_s24  ;;  %p450_p5 = scmp.lt.s32.totalorder %s444_s24, %s444_s24 }
   0xa   :  { %p451_p6 = por %p450_p5, %p449_p4 }
   0xc   :  { %p452_p7 = pnand %p451_p6, %p445_p3 }
   0xe   :  { %455 = shalt.err (!%p452_p7)
}
   0xf   :  { %s459_s25 = smov 128   ;;  %s460_s26 = smov 8  }
  0x10   :  { %23 = dma.hbm_to_vmem [thread:$0]  %s528_s1, 3072, %s18_s16, [#allocation3], %s459_s25, %s459_s25, %s460_s26  }
  0x11   :  { %456 = dma.done.wait [#allocation3], 3072  }
  0x12   :  { %457 = vsyncadd [#allocation3], 4294964224  ;;  %v461_v0 = vmov 0.0|0.0   ;;  %vm462_vm0 = vmmov 0   ;;  %v463_v1 = vmov 0.0   ;;  %v32_v2 = vld [vmem:[#allocation2] sm:$0xff] }
  0x13   :  { %396 = vmatprep.subr.bf16.mxu0 %v461_v0  ;;  %355 = vmatprep.mubr.msk.f32.mxu0 %vm462_vm0, %v463_v1  ;;  %v33_v3 = vld [vmem:[#allocation2 + $0x8] sm:$0xff]  ;;  %v117_v5 = vld [vmem:[#allocation2 + $0x40] sm:$0xff]  ;;  %v119_v7 = vld [vmem:[#allocation2 + $0x50] sm:$0xff]  ;;  %vm41_vm1 = vcmask 130048   ;;  %vm133_vm2 = vcmask 523264  }
  0x14   :  { %399 = vmatprep.subr.bf16.mxu1 %v461_v0  ;;  %374 = vmatprep.mubr.msk.f32.mxu1 %vm462_vm0, %v463_v1  ;;  %v397_v4 = vpack.c.bf16 %v33_v3, %v32_v2  ;;  %v118_v6 = vld [vmem:[#allocation2 + $0x48] sm:$0xff]  ;;  %v120_v9 = vld [vmem:[#allocation2 + $0x58] sm:$0xff]  ;;  %v31_v10 = vld [vmem:[%s527_s0] sm:$0xff] }
  0x15   :  { %v400_v8 = vpack.c.bf16 %v118_v6, %v117_v5  ;;  %v403_v11 = vpack.c.bf16 %v120_v9, %v119_v7  ;;  %v121_v12 = vld [vmem:[#allocation2 + $0x60] sm:$0xff]  ;;  %v122_v13 = vld [vmem:[#allocation2 + $0x68] sm:$0xff]  ;;  %v123_v15 = vld [vmem:[#allocation2 + $0x70] sm:$0xff] }
  0x16   :  { %398 = vmatpush3.bf16.msra.mxu0 %v397_v4  ;;  %v406_v14 = vpack.c.bf16 %v122_v13, %v121_v12  ;;  %v124_v16 = vld [vmem:[#allocation2 + $0x78] sm:$0xff]  ;;  %v209_v18 = vld [vmem:[#allocation2 + $0x80] sm:$0xff]  ;;  %v210_v19 = vld [vmem:[#allocation2 + $0x88] sm:$0xff] }
  0x17   :  { %401 = vmatpush3.bf16.msra.mxu1 %v400_v8  ;;  %411 = vmatprep.subr.bf16.mxu0 %v461_v0  ;;  %v409_v17 = vpack.c.bf16 %v124_v16, %v123_v15  ;;  %v211_v20 = vld [vmem:[#allocation2 + $0x90] sm:$0xff]  ;;  %v412_v21 = vpack.c.bf16 %v210_v19, %v209_v18  ;;  %v212_v22 = vld [vmem:[#allocation2 + $0x98] sm:$0xff]  ;;  %v213_v24 = vld [vmem:[#allocation2 + $0xa0] sm:$0xff] }
  0x18   :  { %402 = vmatprep.subr.bf16.mxu1 %v461_v0  ;;  %v415_v23 = vpack.c.bf16 %v212_v22, %v211_v20  ;;  %v214_v25 = vld [vmem:[#allocation2 + $0xa8] sm:$0xff]  ;;  %v322_v27 = vld [vmem:[%s529_s2] ss:$0 sm:$0xff]  ;;  %v215_v32 = vld [vmem:[#allocation2 + $0xb0] sm:$0xff] }
  0x19   :  { %356 = vmatmul.mubr.msk.f32.vlgmr.msra.gmra.mrb[0].mxu0 %vm41_vm1, %v31_v10  ;;  %v418_v26 = vpack.c.bf16 %v214_v25, %v213_v24  ;;  %v216_v33 = vld [vmem:[#allocation2 + $0xb8] sm:$0xff]  ;;  %v325_v35 = vld [vmem:[%s529_s2 + $0x1] ss:$0 sm:$0xff]  ;;  %v328_v40 = vld [vmem:[%s529_s2 + $0x2] ss:$0 sm:$0xff]  ;;  %s464_s2 = smov 64  }
  0x1a   :  { %393 = vmatprep.mubr.msk.f32.mxu0 %vm462_vm0, %v463_v1  ;;  %413 = vmatpush3.bf16.msra.mxu0 %v412_v21  ;;  %v421_v34 = vpack.c.bf16 %v216_v33, %v215_v32  ;;  %v306_v49 = vld [vmem:[%s530_s3] sm:$0xff] }
  0x1b   :  { %404 = vmatpush3.bf16.msra.mxu1 %v403_v11  ;;  %414 = vmatprep.subr.bf16.mxu0 %v461_v0  ;;  %v307_v50 = vmul.f32 0.1, %v306_v49 }
  0x1c   :  { %405 = vmatprep.subr.bf16.mxu1 %v461_v0 }
  0x1e   :  { %416 = vmatpush3.bf16.msra.mxu0 %v415_v23 }
  0x1f   :  { %407 = vmatpush3.bf16.msra.mxu1 %v406_v14  ;;  %417 = vmatprep.subr.bf16.mxu0 %v461_v0 }
  0x20   :  { %408 = vmatprep.subr.bf16.mxu1 %v461_v0 }
  0x22   :  { %419 = vmatpush3.bf16.msra.mxu0 %v418_v26 }
  0x23   :  { %410 = vmatpush3.bf16.msra.mxu1 %v409_v17  ;;  %420 = vmatprep.subr.bf16.mxu0 %v461_v0 }
  0x26   :  { %422 = vmatpush3.bf16.msra.mxu0 %v421_v34 }
  0xec   :  { %v111_v28 = vpop.f32.mrb[0].mxu0 }
  0xed   :  { %v112_v29 = vadd.f32 %v322_v27, %v111_v28  ;;  %v357_v30 = vpop.f32.mrb[1].mxu0 }
  0xef   :  { %v115_v31 = vmax.f32 %v112_v29, 0.0 }
  0xf1   :  { %375 = vmatmul.mubr.msk.f32.vlgmr.msra.gmra.mrb[0].mxu1 %vm133_vm2, %v115_v31 }
 0x1c4   :  { %v203_v36 = vpop.f32.mrb[0].mxu1 }
 0x1c5   :  { %v204_v37 = vadd.f32 %v325_v35, %v203_v36  ;;  %v376_v38 = vpop.f32.mrb[1].mxu1 }
 0x1c7   :  { %v207_v39 = vmax.f32 %v204_v37, 0.0 }
 0x1c9   :  { %394 = vmatmul.mubr.msk.f32.vlgmr.msra.gmra.mrb[2].mxu0 %vm133_vm2, %v207_v39 }
 0x29c   :  { %v294_v41 = vpop.f32.mrb[2].mxu0 }
 0x29d   :  { %v295_v42 = vadd.f32 %v328_v40, %v294_v41  ;;  %v395_v43 = vpop.f32.mrb[3].mxu0 }
 0x29f   :  { %v298_v44 = vand.u32 2147483647, %v295_v42 }
 0x2a1   :  { %v299_v45 = vsel %vm133_vm2, %v298_v44, 0.0 }
 0x2a2   :  { %300 = vadd.xlane.f32.xlu0 %v299_v45 }
 0x32f   :  { %v301_v46 = vpop.xlane.xlu0 %300 }
 0x330   :  { %v302_v47 = vmul.f32 0.25, %v301_v46 }
 0x332   :  { %v303_v48 = vmax.f32 %v302_v47, 1.0 }
 0x334   :  { %430 = vrcp.f32 %v303_v48 }
 0x33e   :  { %v431_v51 = vpop.eup %430 }
 0x33f   :  { %v305_v52 = vmul.f32 %v431_v51, %v295_v42 }
 0x341   :  { %v308_v53 = vadd.f32 %v307_v50, %v305_v52 }
 0x343   :  { %310 = vrot.lane.b32.xlu0 %v308_v53, %s464_s2 }
 0x3b5   :  { %v311_v54 = vpop.permute.xlu0 %310 }
 0x3b6   :  { %v313_v55 = vsel %vm133_vm2, %v305_v52, %v311_v54 }
 0x3b7   :  { %432 = vtanh.f32 %v313_v55 }
 0x3c1   :  { %v433_v56 = vpop.eup %432 }
 0x3c2   :  { %v315_v57 = vmul.f32 2.0, %v433_v56 }
 0x3c4   :  { %316 = vst [vmem:[%s531_s4] sm:$0xff] %v315_v57 }
 0x3c5   :  { %321 = vsyncpa [#allocation3], 1 }

</bundles_post_ra>
